<compile_context>
chip_gen: v7x
topology: tpu7x:2x2x1
jax: 0.10.0
libtpu: 0.0.40
codegen_flags: <defaults>
</compile_context>

<pallas_src>
import functools
import math

import jax
import jax.numpy as jnp
from jax.experimental import pallas as pl
from jax.experimental.pallas import tpu as pltpu


# ---------------------------------------------------------------------------
# Tile selection helpers (respect the (8, 128) block constraints; prefer >=2
# grid steps along parallel axes so v7x can shard across its two TensorCores,
# and cap tiles so the double-buffered VMEM footprint stays small on v5e/v7x).
# ---------------------------------------------------------------------------
def _tile_m(m, cap=256):
    """Sublane (second-to-last) dim tile: multiple of 8 or full extent."""
    if m <= 8 or m % 8:
        return m
    for t in (cap, 128, 64, 32, 16, 8):
        if t <= m and m % t == 0 and m // t >= 2:
            return t
    return m


def _tile_lane(n, cap=512):
    """Lane (last) dim tile: multiple of 128 or full extent."""
    if n <= cap or n % 128:
        return n
    for t in (cap, 256, 128):
        if n % t == 0:
            return t
    return n


def _tile_k(k, cap=512):
    """Contraction dim tile (last dim of x block / second-to-last of w block)."""
    if k <= cap or k % 128:
        return k
    for t in (cap, 256, 128):
        if k % t == 0:
            return t
    return k


def _tile_kv(lk, cap=512):
    """Key-length tile for flash attention (second-to-last of k/v blocks)."""
    if lk <= cap or lk % 8:
        return lk
    for t in (cap, 256, 128, 64, 32, 16, 8):
        if lk % t == 0:
            return t
    return lk


# ---------------------------------------------------------------------------
# Shared in-kernel LayerNorm over the last axis (f32 math).
# ---------------------------------------------------------------------------
def _ln_last(x_f32, g, b, eps):
    mu = jnp.mean(x_f32, axis=-1, keepdims=True)
    var = jnp.mean(jnp.square(x_f32 - mu), axis=-1, keepdims=True)
    return (x_f32 - mu) * jax.lax.rsqrt(var + eps) * g + b


# ---------------------------------------------------------------------------
# Dense: matmul with fused bias / pre-LayerNorm / (pre-)activation / residual.
# ---------------------------------------------------------------------------
def _dense_nk1_kernel(*refs, act, pre_act, has_ln, has_res, eps):
    # Single K block: no accumulator scratch needed.
    idx = 0
    x_ref = refs[idx]; idx += 1
    w_ref = refs[idx]; idx += 1
    b_ref = refs[idx]; idx += 1
    if has_ln:
        g_ref = refs[idx]; idx += 1
        bb_ref = refs[idx]; idx += 1
    if has_res:
        r_ref = refs[idx]; idx += 1
    o_ref = refs[idx]

    x = x_ref[...]
    if has_ln:                        # fused LayerNorm(norm2/norm3) -> matmul
        x = _ln_last(x.astype(jnp.float32), g_ref[...], bb_ref[...],
                     eps).astype(jnp.bfloat16)
    elif pre_act == "silu":           # AdaLayerNormShift: linear(silu(temb))
        xf = x.astype(jnp.float32)
        x = (xf * jax.nn.sigmoid(xf)).astype(jnp.bfloat16)

    y = jnp.dot(x, w_ref[...], preferred_element_type=jnp.float32) + b_ref[...]
    if act == "silu":
        y = y * jax.nn.sigmoid(y)
    elif act == "gelu_tanh":          # nn.GELU(approximate='tanh')
        y = jax.nn.gelu(y, approximate=True)
    if has_res:
        y = y + r_ref[...].astype(jnp.float32)
    o_ref[...] = y.astype(o_ref.dtype)


def _dense_ktiled_kernel(*refs, act, pre_act, has_res, nk):
    if has_res:
        x_ref, w_ref, b_ref, r_ref, o_ref, acc_ref = refs
    else:
        x_ref, w_ref, b_ref, o_ref, acc_ref = refs
        r_ref = None

    k_step = pl.program_id(2)

    @pl.when(k_step == 0)
    def _():
        acc_ref[...] = jnp.zeros_like(acc_ref)

    x = x_ref[...]
    if pre_act == "silu":
        xf = x.astype(jnp.float32)
        x = (xf * jax.nn.sigmoid(xf)).astype(jnp.bfloat16)

    acc_ref[...] += jnp.dot(x, w_ref[...], preferred_element_type=jnp.float32)

    @pl.when(k_step == nk - 1)
    def _():
        y = acc_ref[...] + b_ref[...]
        if act == "silu":
            y = y * jax.nn.sigmoid(y)
        elif act == "gelu_tanh":
            y = jax.nn.gelu(y, approximate=True)
        if has_res:
            y = y + r_ref[...].astype(jnp.float32)
        o_ref[...] = y.astype(o_ref.dtype)


def dense(x, w, b, act="none", pre_act="none", pre_ln=None, residual=None,
          out_dtype=jnp.bfloat16, eps=1e-6):
    m, kdim = x.shape
    n = w.shape[1]
    tm, tn = _tile_m(m), _tile_lane(n)
    tk = kdim if pre_ln is not None else _tile_k(kdim)   # LN needs the full row
    nk = kdim // tk

    args = [x.astype(jnp.bfloat16), w.astype(jnp.bfloat16),
            b.reshape(1, n).astype(jnp.float32)]

    if nk == 1:
        in_specs = [
            pl.BlockSpec((tm, kdim), lambda i, j: (i, 0)),
            pl.BlockSpec((kdim, tn), lambda i, j: (0, j)),
            pl.BlockSpec((1, tn), lambda i, j: (0, j)),
        ]
        if pre_ln is not None:
            g, bb = pre_ln
            in_specs += [pl.BlockSpec((1, kdim), lambda i, j: (0, 0))] * 2
            args += [g.reshape(1, kdim).astype(jnp.float32),
                     bb.reshape(1, kdim).astype(jnp.float32)]
        if residual is not None:
            in_specs.append(pl.BlockSpec((tm, tn), lambda i, j: (i, j)))
            args.append(residual.astype(jnp.bfloat16))
        return pl.pallas_call(
            functools.partial(_dense_nk1_kernel, act=act, pre_act=pre_act,
                              has_ln=pre_ln is not None,
                              has_res=residual is not None, eps=eps),
            out_shape=jax.ShapeDtypeStruct((m, n), out_dtype),
            grid=(m // tm, n // tn),
            in_specs=in_specs,
            out_specs=pl.BlockSpec((tm, tn), lambda i, j: (i, j)),
            compiler_params=pltpu.CompilerParams(
                dimension_semantics=("parallel", "parallel")),
        )(*args)

    # K-tiled path: f32 VMEM accumulator, reduction axis last.
    in_specs = [
        pl.BlockSpec((tm, tk), lambda i, j, k: (i, k)),
        pl.BlockSpec((tk, tn), lambda i, j, k: (k, j)),
        pl.BlockSpec((1, tn), lambda i, j, k: (0, j)),
    ]
    if residual is not None:
        in_specs.append(pl.BlockSpec((tm, tn), lambda i, j, k: (i, j)))
        args.append(residual.astype(jnp.bfloat16))
    return pl.pallas_call(
        functools.partial(_dense_ktiled_kernel, act=act, pre_act=pre_act,
                          has_res=residual is not None, nk=nk),
        out_shape=jax.ShapeDtypeStruct((m, n), out_dtype),
        grid=(m // tm, n // tn, nk),
        in_specs=in_specs,
        out_specs=pl.BlockSpec((tm, tn), lambda i, j, k: (i, j)),
        scratch_shapes=[pltpu.VMEM((tm, tn), jnp.float32)],
        compiler_params=pltpu.CompilerParams(
            dimension_semantics=("parallel", "parallel", "arbitrary")),
    )(*args)


# ---------------------------------------------------------------------------
# Fused 2-layer MLP (tiny embedder paths — one launch, hidden stays in VMEM).
# ---------------------------------------------------------------------------
def _mlp2_kernel(x_ref, w1_ref, b1_ref, w2_ref, b2_ref, o_ref, *, act):
    h = jnp.dot(x_ref[...], w1_ref[...],
                preferred_element_type=jnp.float32) + b1_ref[...]
    if act == "silu":
        h = h * jax.nn.sigmoid(h)
    elif act == "gelu_tanh":
        h = jax.nn.gelu(h, approximate=True)
    y = jnp.dot(h.astype(jnp.bfloat16), w2_ref[...],
                preferred_element_type=jnp.float32) + b2_ref[...]
    o_ref[...] = y.astype(o_ref.dtype)


def mlp2(x, w1, b1, w2, b2, act="silu"):
    m, k1 = x.shape
    n1, n2 = w1.shape[1], w2.shape[1]
    return pl.pallas_call(
        functools.partial(_mlp2_kernel, act=act),
        out_shape=jax.ShapeDtypeStruct((m, n2), jnp.bfloat16),
        grid=(1,),
        in_specs=[
            pl.BlockSpec((m, k1), lambda i: (0, 0)),
            pl.BlockSpec((k1, n1), lambda i: (0, 0)),
            pl.BlockSpec((1, n1), lambda i: (0, 0)),
            pl.BlockSpec((n1, n2), lambda i: (0, 0)),
            pl.BlockSpec((1, n2), lambda i: (0, 0)),
        ],
        out_specs=pl.BlockSpec((m, n2), lambda i: (0, 0)),
        compiler_params=pltpu.CompilerParams(dimension_semantics=("arbitrary",)),
    )(x.astype(jnp.bfloat16), w1.astype(jnp.bfloat16),
      b1.reshape(1, n1).astype(jnp.float32),
      w2.astype(jnp.bfloat16), b2.reshape(1, n2).astype(jnp.float32))


# ---------------------------------------------------------------------------
# LayerNorm with fused AdaLayerNormShift add (only used for norm1; norm2/norm3
# are fused directly into the consuming dense kernels via pre_ln).
# ---------------------------------------------------------------------------
def _ln_kernel(*refs, eps, has_shift):
    if has_shift:
        x_ref, g_ref, b_ref, s_ref, o_ref = refs
    else:
        x_ref, g_ref, b_ref, o_ref = refs
        s_ref = None
    x = x_ref[0].astype(jnp.float32)                       # (tl, D)
    y = _ln_last(x, g_ref[...], b_ref[...], eps)
    if has_shift:
        y = y + s_ref[0]
    o_ref[0] = y.astype(o_ref.dtype)


def layernorm(x, gamma, beta, shift=None, eps=1e-6):
    b, l, d = x.shape
    tl = _tile_m(l)
    in_specs = [
        pl.BlockSpec((1, tl, d), lambda bi, i: (bi, i, 0)),
        pl.BlockSpec((1, d), lambda bi, i: (0, 0)),
        pl.BlockSpec((1, d), lambda bi, i: (0, 0)),
    ]
    args = [x.astype(jnp.bfloat16),
            gamma.reshape(1, d).astype(jnp.float32),
            beta.reshape(1, d).astype(jnp.float32)]
    if shift is not None:
        in_specs.append(pl.BlockSpec((1, 1, d), lambda bi, i: (bi, 0, 0)))
        args.append(shift.reshape(b, 1, d).astype(jnp.float32))
    return pl.pallas_call(
        functools.partial(_ln_kernel, eps=eps, has_shift=shift is not None),
        out_shape=jax.ShapeDtypeStruct((b, l, d), jnp.bfloat16),
        grid=(b, l // tl),
        in_specs=in_specs,
        out_specs=pl.BlockSpec((1, tl, d), lambda bi, i: (bi, i, 0)),
        compiler_params=pltpu.CompilerParams(
            dimension_semantics=("parallel", "parallel")),
    )(*args)


# ---------------------------------------------------------------------------
# Attention: all heads per grid step.  Single-pass softmax when KV fits one
# tile; flash-style online softmax over a kv grid axis otherwise (with Q
# LayerNorm + softmax scale hoisted into a scratch at kv step 0).  Fused
# per-head qk LayerNorm; EUP reciprocal for the softmax normalization.
# ---------------------------------------------------------------------------
def _attn_single_kernel(*refs, scale, qk_norm, eps):
    if qk_norm:
        q_ref, k_ref, v_ref, qg_ref, qb_ref, kg_ref, kb_ref, o_ref = refs
    else:
        q_ref, k_ref, v_ref, o_ref = refs

    if qk_norm:
        q = (_ln_last(q_ref[0].astype(jnp.float32), qg_ref[...], qb_ref[...],
                      eps) * scale).astype(jnp.bfloat16)
        k = _ln_last(k_ref[0].astype(jnp.float32), kg_ref[...], kb_ref[...],
                     eps).astype(jnp.bfloat16)
    else:
        q = (q_ref[0].astype(jnp.float32) * scale).astype(jnp.bfloat16)
        k = k_ref[0]
    v = v_ref[0]                                           # (H, Lk, dh) bf16

    # contraction over dh via batched dot_general — no explicit K transpose
    s = jnp.einsum("hqd,hkd->hqk", q, k, preferred_element_type=jnp.float32)
    m = jnp.max(s, axis=-1, keepdims=True)
    p = jnp.exp(s - m)
    l = jnp.sum(p, axis=-1, keepdims=True)
    o = jnp.einsum("hqk,hkd->hqd", p.astype(jnp.bfloat16), v,
                   preferred_element_type=jnp.float32)
    o_ref[0] = (o * pl.reciprocal(l, approx=True)).astype(o_ref.dtype)


def _attn_flash_kernel(*refs, scale, qk_norm, eps):
    if qk_norm:
        (q_ref, k_ref, v_ref, qg_ref, qb_ref, kg_ref, kb_ref,
         o_ref, q_sc, m_sc, l_sc, acc_sc) = refs
    else:
        q_ref, k_ref, v_ref, o_ref, q_sc, m_sc, l_sc, acc_sc = refs

    j = pl.program_id(1)

    @pl.when(j == 0)
    def _():
        qf = q_ref[0].astype(jnp.float32)
        if qk_norm:
            qf = _ln_last(qf, qg_ref[...], qb_ref[...], eps)
        q_sc[...] = (qf * scale).astype(jnp.bfloat16)      # Q LN + scale once
        m_sc[...] = jnp.full_like(m_sc, -jnp.inf)
        l_sc[...] = jnp.zeros_like(l_sc)
        acc_sc[...] = jnp.zeros_like(acc_sc)

    if qk_norm:
        k = _ln_last(k_ref[0].astype(jnp.float32), kg_ref[...], kb_ref[...],
                     eps).astype(jnp.bfloat16)
    else:
        k = k_ref[0]                                       # (H, tkv, dh) bf16
    v = v_ref[0]

    s = jnp.einsum("hqd,hkd->hqk", q_sc[...], k,
                   preferred_element_type=jnp.float32)
    m_new = jnp.maximum(m_sc[...], jnp.max(s, axis=-1, keepdims=True))
    alpha = jnp.exp(m_sc[...] - m_new)
    p = jnp.exp(s - m_new)
    l_sc[...] = alpha * l_sc[...] + jnp.sum(p, axis=-1, keepdims=True)
    acc_sc[...] = alpha * acc_sc[...] + jnp.einsum(
        "hqk,hkd->hqd", p.astype(jnp.bfloat16), v,
        preferred_element_type=jnp.float32)
    m_sc[...] = m_new

    @pl.when(j == pl.num_programs(1) - 1)
    def _():
        o_ref[0] = (acc_sc[...] *
                    pl.reciprocal(l_sc[...], approx=True)).astype(o_ref.dtype)


def attention(q, k, v, scale, qk_norm_params=None, eps=1e-6):
    b, h, lq, dh = q.shape
    lk = k.shape[2]
    tkv = _tile_kv(lk)
    nkv = lk // tkv
    qk_norm = qk_norm_params is not None

    args = [q.astype(jnp.bfloat16), k.astype(jnp.bfloat16),
            v.astype(jnp.bfloat16)]
    norm_args = []
    if qk_norm:
        norm_args = [a.reshape(1, dh).astype(jnp.float32)
                     for a in qk_norm_params]               # qn_g, qn_b, kn_g, kn_b

    if nkv == 1:
        in_specs = [
            pl.BlockSpec((1, h, lq, dh), lambda bi: (bi, 0, 0, 0)),
            pl.BlockSpec((1, h, lk, dh), lambda bi: (bi, 0, 0, 0)),
            pl.BlockSpec((1, h, lk, dh), lambda bi: (bi, 0, 0, 0)),
        ]
        if qk_norm:
            in_specs += [pl.BlockSpec((1, dh), lambda bi: (0, 0))] * 4
        return pl.pallas_call(
            functools.partial(_attn_single_kernel, scale=scale,
                              qk_norm=qk_norm, eps=eps),
            out_shape=jax.ShapeDtypeStruct((b, h, lq, dh), jnp.bfloat16),
            grid=(b,),
            in_specs=in_specs,
            out_specs=pl.BlockSpec((1, h, lq, dh), lambda bi: (bi, 0, 0, 0)),
            compiler_params=pltpu.CompilerParams(
                dimension_semantics=("parallel",)),
        )(*args, *norm_args)

    in_specs = [
        pl.BlockSpec((1, h, lq, dh), lambda bi, j: (bi, 0, 0, 0)),
        pl.BlockSpec((1, h, tkv, dh), lambda bi, j: (bi, 0, j, 0)),
        pl.BlockSpec((1, h, tkv, dh), lambda bi, j: (bi, 0, j, 0)),
    ]
    if qk_norm:
        in_specs += [pl.BlockSpec((1, dh), lambda bi, j: (0, 0))] * 4
    return pl.pallas_call(
        functools.partial(_attn_flash_kernel, scale=scale,
                          qk_norm=qk_norm, eps=eps),
        out_shape=jax.ShapeDtypeStruct((b, h, lq, dh), jnp.bfloat16),
        grid=(b, nkv),
        in_specs=in_specs,
        out_specs=pl.BlockSpec((1, h, lq, dh), lambda bi, j: (bi, 0, 0, 0)),
        scratch_shapes=[pltpu.VMEM((h, lq, dh), jnp.bfloat16),
                        pltpu.VMEM((h, lq, 1), jnp.float32),
                        pltpu.VMEM((h, lq, 1), jnp.float32),
                        pltpu.VMEM((h, lq, dh), jnp.float32)],
        compiler_params=pltpu.CompilerParams(
            dimension_semantics=("parallel", "arbitrary")),
    )(*args, *norm_args)


# ---------------------------------------------------------------------------
# Glue: head split/merge and composite modules.
# ---------------------------------------------------------------------------
def _to_heads(x_flat, b, l, heads):
    dh = x_flat.shape[-1] // heads
    return x_flat.reshape(b, l, heads, dh).transpose(0, 2, 1, 3)


def _from_heads(x):                                        # (b, h, l, dh) -> (b*l, h*dh)
    b, h, l, dh = x.shape
    return x.transpose(0, 2, 1, 3).reshape(b * l, h * dh)


def self_attention(x, residual, p, heads):
    """diffusers Attention + HunyuanAttnProcessor2_0 (self, qk_norm, no rotary)."""
    b, l, d = x.shape
    qkv = dense(x.reshape(b * l, d), p["wqkv"], p["bqkv"])     # fused Q/K/V, (BL, 3D)
    qh = _to_heads(qkv[:, :d], b, l, heads)
    kh = _to_heads(qkv[:, d:2 * d], b, l, heads)
    vh = _to_heads(qkv[:, 2 * d:], b, l, heads)
    dh = d // heads
    o = attention(qh, kh, vh, scale=1.0 / math.sqrt(dh),
                  qk_norm_params=(p["qn_g"], p["qn_b"], p["kn_g"], p["kn_b"]))
    o = _from_heads(o)
    return dense(o, p["wo"], p["bo"],
                 residual=residual.reshape(b * l, d)).reshape(b, l, d)


def cross_attention(x, q_ln, x_kv, residual, p, heads):
    """Cross-attention: norm2 fused into the Q projection, K/V projection fused,
    residual add fused into the output projection."""
    b, lq, d = x.shape
    lk = x_kv.shape[1]
    q = dense(x.reshape(b * lq, d), p["wq"], p["bq"], pre_ln=q_ln)
    kv = dense(x_kv.reshape(b * lk, x_kv.shape[2]), p["wkv"], p["bkv"])  # (B*Lk, 2D)
    qh = _to_heads(q, b, lq, heads)
    kh = _to_heads(kv[:, :d], b, lk, heads)
    vh = _to_heads(kv[:, d:], b, lk, heads)
    dh = d // heads
    o = attention(qh, kh, vh, scale=1.0 / math.sqrt(dh),
                  qk_norm_params=(p["qn_g"], p["qn_b"], p["kn_g"], p["kn_b"]))
    o = _from_heads(o)
    return dense(o, p["wo"], p["bo"],
                 residual=residual.reshape(b * lq, d)).reshape(b, lq, d)


def sinusoidal_embedding(t, dim=256):
    """diffusers Timesteps(dim, flip_sin_to_cos=True, downscale_freq_shift=0)."""
    half = dim // 2
    freqs = jnp.exp(-math.log(10000.0) * jnp.arange(half, dtype=jnp.float32) / half)
    args = t.astype(jnp.float32).reshape(-1, 1) * freqs[None, :]
    return jnp.concatenate([jnp.cos(args), jnp.sin(args)], axis=-1)


def attention_pool(x, p, heads):
    """HunyuanDiTAttentionPool (query = pooled token only)."""
    b, lt, c = x.shape
    xf = x.astype(jnp.float32)
    mean = jnp.mean(xf, axis=1, keepdims=True)
    xc = (jnp.concatenate([mean, xf], axis=1) + p["pos"][None]).astype(jnp.bfloat16)
    q = dense(xc[:, 0, :], p["wq"], p["bq"])                   # (b, c)
    kv = dense(xc.reshape(b * (lt + 1), c), p["wkv"], p["bkv"])  # fused K/V (b*(lt+1), 2c)
    dh = c // heads
    qh = _to_heads(q, b, 1, heads)
    kh = _to_heads(kv[:, :c], b, lt + 1, heads)
    vh = _to_heads(kv[:, c:], b, lt + 1, heads)
    o = attention(qh, kh, vh, scale=1.0 / math.sqrt(dh))
    o = _from_heads(o)                                         # (b, c)
    return dense(o, p["wc"], p["bc"])                          # -> pooled_projection_dim


# ---------------------------------------------------------------------------
# Parameter init (deterministic, synthetic).  Weights bf16, biases/LN f32.
# ---------------------------------------------------------------------------
def _linear(key, fan_in, fan_out, scale=0.02):
    kw, kb = jax.random.split(key)
    w = (jax.random.normal(kw, (fan_in, fan_out), jnp.float32) * scale).astype(jnp.bfloat16)
    b = jax.random.normal(kb, (fan_out,), jnp.float32) * 0.01
    return w, b


def init_params(key, cfg):
    D = cfg["hidden"]
    Dh = D // cfg["heads"]
    keys = iter(jax.random.split(key, 64))
    p = {}
    # PatchEmbed conv (as matmul)
    p["patch_w"], p["patch_b"] = _linear(next(keys), cfg["in_channels"] * cfg["patch"] ** 2, D)
    # TimestepEmbedding(256 -> D)
    p["t_w1"], p["t_b1"] = _linear(next(keys), 256, D)
    p["t_w2"], p["t_b2"] = _linear(next(keys), D, D)
    # HunyuanDiTAttentionPool (K/V fused)
    c5 = cfg["cross_dim_t5"]
    pool = {"pos": jax.random.normal(next(keys), (cfg["text_len_t5"] + 1, c5), jnp.float32) / math.sqrt(c5)}
    pool["wq"], pool["bq"] = _linear(next(keys), c5, c5)
    pool["wkv"], pool["bkv"] = _linear(next(keys), c5, 2 * c5)
    pool["wc"], pool["bc"] = _linear(next(keys), c5, cfg["pooled_dim"])
    p["pool"] = pool
    # style embedding (nn.Embedding(1, D))
    p["style_emb"] = jax.random.normal(next(keys), (1, D), jnp.float32) * 0.02
    # extra embedder (PixArtAlphaTextProjection, act='silu_fp32')
    extra_in = 256 * 6 + cfg["pooled_dim"] + D
    p["e_w1"], p["e_b1"] = _linear(next(keys), extra_in, D * 4)
    p["e_w2"], p["e_b2"] = _linear(next(keys), D * 4, D)
    # HunyuanDiTBlock
    p["shift_w"], p["shift_b"] = _linear(next(keys), D, D)         # AdaLayerNormShift linear
    for name in ("n1", "n2", "n3"):
        p[name + "_g"] = jnp.ones((D,), jnp.float32)
        p[name + "_b"] = jnp.zeros((D,), jnp.float32)

    def attn_params(kv_dim, fused_qkv):
        a = {}
        if fused_qkv:
            a["wqkv"], a["bqkv"] = _linear(next(keys), D, 3 * D)
        else:
            a["wq"], a["bq"] = _linear(next(keys), D, D)
            a["wkv"], a["bkv"] = _linear(next(keys), kv_dim, 2 * D)
        a["wo"], a["bo"] = _linear(next(keys), D, D)
        a["qn_g"], a["qn_b"] = jnp.ones((Dh,), jnp.float32), jnp.zeros((Dh,), jnp.float32)
        a["kn_g"], a["kn_b"] = jnp.ones((Dh,), jnp.float32), jnp.zeros((Dh,), jnp.float32)
        return a

    p["attn1"] = attn_params(D, fused_qkv=True)                 # self-attention
    p["attn2"] = attn_params(cfg["cross_dim"], fused_qkv=False)  # cross-attention
    ff_inner = int(D * cfg["mlp_ratio"])
    p["ff_w1"], p["ff_b1"] = _linear(next(keys), D, ff_inner)
    p["ff_w2"], p["ff_b2"] = _linear(next(keys), ff_inner, D)
    return p


# ---------------------------------------------------------------------------
# PoseNet forward
# ---------------------------------------------------------------------------
def posenet_forward(params, hidden_states, timestep, encoder_hidden_states,
                    encoder_hidden_states_t5, image_meta_size, style, cfg):
    B, C, F, H, W = hidden_states.shape
    pz, D, heads = cfg["patch"], cfg["hidden"], cfg["heads"]
    Hp, Wp = H // pz, W // pz
    L = F * Hp * Wp

    # --- PatchEmbed: 'b c f h w -> (b f) c h w', conv(p, stride p) as matmul ---
    x = hidden_states.transpose(0, 2, 1, 3, 4)                        # (B, F, C, H, W)
    x = x.reshape(B, F, C, Hp, pz, Wp, pz)
    x = x.transpose(0, 1, 3, 5, 2, 4, 6).reshape(B * L, C * pz * pz)  # (C,p,p)-ordered patches
    tokens = dense(x, params["patch_w"], params["patch_b"]).reshape(B, L, D)

    # --- HunyuanCombinedTimestepTextSizeStyleEmbedding ---
    t_proj = sinusoidal_embedding(timestep, 256)
    t_emb = mlp2(t_proj, params["t_w1"], params["t_b1"],
                 params["t_w2"], params["t_b2"], act="silu")
    pooled = attention_pool(encoder_hidden_states_t5, params["pool"],
                            heads=cfg["pool_heads"])
    size_emb = sinusoidal_embedding(image_meta_size.reshape(-1), 256).reshape(B, 6 * 256)
    style_emb = jnp.take(params["style_emb"], style, axis=0)
    extra = jnp.concatenate([pooled.astype(jnp.bfloat16),
                             size_emb.astype(jnp.bfloat16),
                             style_emb.astype(jnp.bfloat16)], axis=-1)
    extra_emb = mlp2(extra, params["e_w1"], params["e_b1"],
                     params["e_w2"], params["e_b2"], act="silu")
    temb = t_emb + extra_emb                                          # (B, D) bf16

    # --- HunyuanDiTBlock ('basic', skip=False, after_norm=False) ---
    # TODO(synk): image_rotary_emb rotary path and enable_inpaint clip-attention branch
    #             not implemented (both disabled in this configuration / call).
    shift = dense(temb, params["shift_w"], params["shift_b"], pre_act="silu")  # AdaLayerNormShift
    n1 = layernorm(tokens, params["n1_g"], params["n1_b"], shift=shift)
    tokens = self_attention(n1, tokens, params["attn1"], heads)

    # norm2 fused into the cross-attention Q projection
    tokens = cross_attention(tokens, (params["n2_g"], params["n2_b"]),
                             encoder_hidden_states, tokens, params["attn2"], heads)

    # norm3 fused into the FF first matmul; residual fused into the second
    tokens_flat = tokens.reshape(B * L, D)
    h = dense(tokens_flat, params["ff_w1"], params["ff_b1"], act="gelu_tanh",
              pre_ln=(params["n3_g"], params["n3_b"]))
    tokens = dense(h, params["ff_w2"], params["ff_b2"],
                   residual=tokens_flat).reshape(B, L, D)
    return tokens


# ---------------------------------------------------------------------------
if __name__ == "__main__":
    cfg = dict(
        in_channels=4, patch=2, hidden=32, heads=4,          # inner_dim = heads*head_dim = hidden
        cross_dim=32, text_len=16,
        cross_dim_t5=32, text_len_t5=8, pooled_dim=16, pool_heads=8,
        mlp_ratio=4.0,
    )
    B, C, F, H, W = 2, cfg["in_channels"], 2, 16, 16

    root = jax.random.PRNGKey(0)
    kp, k1, k2, k3, k4 = jax.random.split(root, 5)
    params = init_params(kp, cfg)

    hidden_states = jax.random.normal(k1, (B, C, F, H, W), jnp.float32)          # b c f h w
    timestep = jax.random.uniform(k2, (B,), jnp.float32, 0.0, 1000.0)
    encoder_hidden_states = jax.random.normal(k3, (B, cfg["text_len"], cfg["cross_dim"]), jnp.float32)
    encoder_hidden_states_t5 = jax.random.normal(k4, (B, cfg["text_len_t5"], cfg["cross_dim_t5"]), jnp.float32)
    image_meta_size = jnp.tile(jnp.array([[16.0, 16.0, 16.0, 16.0, 0.0, 0.0]], jnp.float32), (B, 1))
    style = jnp.zeros((B,), jnp.int32)

    out = posenet_forward(params, hidden_states, timestep, encoder_hidden_states,
                          encoder_hidden_states_t5, image_meta_size, style, cfg)
    out = jax.block_until_ready(out)
    L = F * (H // cfg["patch"]) * (W // cfg["patch"])
    assert out.shape == (B, L, cfg["hidden"]), out.shape
    assert jnp.all(jnp.isfinite(out.astype(jnp.float32)))
    print("KERNEL_OK")
</pallas_src>

<mosaic_0001>
module attributes {stable_mosaic.version = 11 : i64} {
  func.func @_dense_nk1_kernel(%arg0: i32, %arg1: i32, %arg2: memref<128x16xbf16, #tpu.memory_space<vmem>>, %arg3: memref<16x32xbf16, #tpu.memory_space<vmem>>, %arg4: memref<1x32xf32, #tpu.memory_space<vmem>>, %arg5: memref<128x32xbf16, #tpu.memory_space<vmem>>) attributes {dimension_semantics = [#tpu.dimension_semantics<parallel>, #tpu.dimension_semantics<parallel>], iteration_bounds = array<i64: 2, 1>, scalar_prefetch = 0 : i64, scratch_operands = 0 : i64, tpu.core_type = #tpu.core_type<tc>, window_params = [{transform_indices = @transform_0, window_bounds = array<i64: 128, 16>}, {transform_indices = @transform_1, window_bounds = array<i64: 16, 32>}, {transform_indices = @transform_2, window_bounds = array<i64: 1, 32>}, {transform_indices = @transform_3, window_bounds = array<i64: 128, 32>}]} {
    %c0 = arith.constant 0 : index
    %c0_0 = arith.constant 0 : index
    %0 = vector.load %arg2[%c0, %c0_0] : memref<128x16xbf16, #tpu.memory_space<vmem>>, vector<128x16xbf16>
    %c0_1 = arith.constant 0 : index
    %c0_2 = arith.constant 0 : index
    %1 = vector.load %arg3[%c0_1, %c0_2] : memref<16x32xbf16, #tpu.memory_space<vmem>>, vector<16x32xbf16>
    %cst = arith.constant dense<0.000000e+00> : vector<128x32xf32>
    %2 = tpu.matmul %0, %1, %cst {dimension_numbers = #tpu.dot_dimension_numbers<[1], [0], [0], [1], [0, 0, 1, 1], [], []>} : vector<128x16xbf16>, vector<16x32xbf16>, vector<128x32xf32> -> vector<128x32xf32>
    %c0_3 = arith.constant 0 : index
    %c0_4 = arith.constant 0 : index
    %3 = vector.load %arg4[%c0_3, %c0_4] : memref<1x32xf32, #tpu.memory_space<vmem>>, vector<1x32xf32>
    %4 = vector.broadcast %3 : vector<1x32xf32> to vector<128x32xf32>
    %5 = arith.addf %2, %4 : vector<128x32xf32>
    %6 = arith.truncf %5 : vector<128x32xf32> to vector<128x32xbf16>
    %c0_5 = arith.constant 0 : index
    %c0_6 = arith.constant 0 : index
    %7 = vector.load %arg5[%c0_5, %c0_6] : memref<128x32xbf16, #tpu.memory_space<vmem>>, vector<128x32xbf16>
    tpu.vector_store %arg5[%c0_5, %c0_6], %6 {strides = array<i32>} : memref<128x32xbf16, #tpu.memory_space<vmem>>, vector<128x32xbf16>,
    return
  }
  func.func @transform_0(%arg0: i32, %arg1: i32) -> (i32, i32) {
    %c0_i32 = arith.constant 0 : i32
    %c0_i32_0 = arith.constant 0 : i32
    return %arg0, %c0_i32 : i32, i32
  }
  func.func @transform_1(%arg0: i32, %arg1: i32) -> (i32, i32) {
    %c0_i32 = arith.constant 0 : i32
    %c0_i32_0 = arith.constant 0 : i32
    return %c0_i32, %arg1 : i32, i32
  }
  func.func @transform_2(%arg0: i32, %arg1: i32) -> (i32, i32) {
    %c0_i32 = arith.constant 0 : i32
    %c0_i32_0 = arith.constant 0 : i32
    return %c0_i32, %arg1 : i32, i32
  }
  func.func @transform_3(%arg0: i32, %arg1: i32) -> (i32, i32) {
    %c0_i32 = arith.constant 0 : i32
    return %arg0, %arg1 : i32, i32
  }
}

</mosaic_0001>

<bundles_post_ra>
// kernel: tpu_custom_call.1
= control target key start
LH: loop header
LB: loop body
LE: loop exit
PB: predicated region body
PF: predicated region fallthrough
CT: control target
= control target key end

     0   :  { %s771_s12 = smov 0   ;;  %s773_s13 = smov 0   ;;  %s852_s0 = inlined_call_operand.vmem [shape: bf16[256,16], index: 0, kind: input, shape index: {}]   ;;  %s853_s1 = inlined_call_operand.vmem [shape: bf16[16,32], index: 1, kind: input, shape index: {}]   ;;  %s854_s2 = inlined_call_operand.vmem [shape: f32[1,32], index: 2, kind: input, shape index: {}]   ;;  %s855_s3 = inlined_call_operand.vmem [shape: bf16[256,32], index: 3, kind: output, shape index: {}]  }
   0x1   :  { %s775_s14 = smov 0  }
   0x2 LB: > { %s25_s15 = sadd.s32 1, %s745_s13  ;;  %p608_p0 = scmp.ge.s32.totalorder %s749_s14, 1  ;;  %s749_s14 = sphi %s775_s14, %s13_s14   ;;  %s745_s13 = sphi %s773_s13, %s857_s13   ;;  %s741_s12 = sphi %s771_s12, %s856_s12  }
   0x3   : > { %p27_p1 = scmp.ge.s32.totalorder %s25_s15, 2  ;;  %p169_p2 = scmp.lt.s32.totalorder %s749_s14, 3 }
   0x5   : > { %s859_s15 = smov (%p27_p1, %s25_s15), 0  ;;  %p170_p3 = pnand %p608_p0, %p169_p2 }
   0x6   : > { %v718_v0 = vld [vmem:[%s853_s1] sm:$0xff] (!%p170_p3)   ;;  %s609_s18 = sshll.u32 (!%p170_p3), %s741_s12, 4  ;;  %vm297_vm0 = vcmask (!%p170_p3), 130048   ;;  %vm483_vm1 = vcmask (!%p170_p3), 257024  }
   0x7   : > { %173 = sbr.rel (%p170_p3) target bundleno = 248 (0xf8), region = 32  ;;  %p204_p4 = scmp.lt.s32.totalorder (!%p170_p3), %s609_s18, 31  ;;  %674 = vmatprep.subr.bf16.mxu0 (!%p170_p3), %v718_v0  ;;  %692 = vmatprep.subr.bf16.mxu1 (!%p170_p3), %v718_v0  ;;  %v613_v9 = vld [vmem:[%s854_s2] ss:$0 sm:$0xff] (!%p170_p3) }
   0x8   : > { %675 = vmatpush3.bf16.msra.mxu0 (!%p170_p3), %v718_v0  ;;  %693 = vmatpush3.bf16.msra.mxu1 (!%p170_p3), %v718_v0 }
   0xe   : > { %s861_s18 = smov (!%p204_p4, %s609_s18), 31 }
   0xf   : > { %s610_s19 = sshll.u32 %s861_s18, 2 }
  0x10   : > { %s207_s22 = scalar_lea.vmem %s852_s0, %s610_s19  ;;  %s809_s27 = scalar_lea.vmem %s855_s3, %s610_s19 }
  0x11   : > { %v719_v1 = vld [vmem:[%s207_s22] sm:$0xff]   ;;  %v721_v3 = vld [vmem:[%s207_s22 + $0x8] sm:$0xff]   ;;  %v723_v5 = vld [vmem:[%s207_s22 + $0x10] sm:$0xff]  }
  0x12   : > { %v720_v2 = vld [vmem:[%s207_s22 + $0x20] sm:$0xff]   ;;  %676 = vmatprep.mubr.msk.bf16.mxu0 %vm297_vm0, %v719_v1  ;;  %v722_v4 = vld [vmem:[%s207_s22 + $0x28] sm:$0xff]   ;;  %v724_v6 = vld [vmem:[%s207_s22 + $0x30] sm:$0xff]  }
  0x13   : > { %684 = vmatprep.mubr.msk.bf16.mxu1 %vm297_vm0, %v720_v2  ;;  %677 = vmatmul.mubr.msk.bf16.vlgmr.msra.gmra.mrb[0].mxu0 %vm297_vm0, %v721_v3  ;;  %v725_v7 = vld [vmem:[%s207_s22 + $0x18] sm:$0xff]  }
  0x14   : > { %685 = vmatmul.mubr.msk.bf16.vlgmr.msra.gmra.mrb[0].mxu1 %vm297_vm0, %v722_v4  ;;  %680 = vmatprep.mubr.msk.bf16.mxu0 %vm297_vm0, %v723_v5  ;;  %v726_v8 = vld [vmem:[%s207_s22 + $0x38] sm:$0xff]  }
  0x15   : > { %688 = vmatprep.mubr.msk.bf16.mxu1 %vm297_vm0, %v724_v6 }
  0x1b   : > { %681 = vmatmul.mubr.msk.bf16.gmra.mrb[4].mxu0 %vm297_vm0, %v725_v7 }
  0x1c   : > { %689 = vmatmul.mubr.msk.bf16.gmra.mrb[4].mxu1 %vm297_vm0, %v726_v8 }
  0xe6   : > { %v678_v10 = vpop.f32.mrb[0].mxu0 }
  0xe7   : > { %v365_v11 = vadd.f32 %v678_v10, %v613_v9  ;;  %v686_v12 = vpop.f32.mrb[0].mxu1  ;;  %v356_v13 = vpop.f32.mrb[1].mxu0 }
  0xe8   : > { %v397_v14 = vadd.f32 %v686_v12, %v613_v9  ;;  %v357_v15 = vadd.f32 %v613_v9, %v356_v13  ;;  %v388_v16 = vpop.f32.mrb[1].mxu1  ;;  %v679_v17 = vpop.f32.mrb[2].mxu0 }
  0xe9   : > { %v651_v18 = vpack.c.bf16 %v365_v11, %v365_v11  ;;  %v389_v19 = vadd.f32 %v613_v9, %v388_v16  ;;  %v368_v20 = vadd.f32 %v679_v17, %v613_v9  ;;  %v687_v21 = vpop.f32.mrb[2].mxu1  ;;  %v359_v22 = vpop.f32.mrb[3].mxu0 }
  0xea   : > { %v659_v23 = vpack.c.bf16 %v397_v14, %v397_v14  ;;  %v649_v24 = vpack.c.bf16 %v357_v15, %v357_v15  ;;  %v400_v25 = vadd.f32 %v687_v21, %v613_v9  ;;  %v360_v26 = vadd.f32 %v613_v9, %v359_v22  ;;  %v391_v27 = vpop.f32.mrb[3].mxu1 }
  0xeb   : > { %486 = vst.msk [vmem:[%s809_s27 + $0x8] sm:$0xf] %vm483_vm1, %v651_v18  ;;  %v657_v28 = vpack.c.bf16 %v389_v19, %v389_v19  ;;  %v652_v29 = vpack.c.bf16 %v368_v20, %v368_v20  ;;  %v392_v30 = vadd.f32 %v613_v9, %v391_v27 }
  0xec   : > { %494 = vst.msk [vmem:[%s809_s27 + $0x28] sm:$0xf] %vm483_vm1, %v659_v23  ;;  %484 = vst.msk [vmem:[%s809_s27] sm:$0xf] %vm483_vm1, %v649_v24  ;;  %v660_v31 = vpack.c.bf16 %v400_v25, %v400_v25  ;;  %v650_v32 = vpack.c.bf16 %v360_v26, %v360_v26 }
  0xed   : > { %492 = vst.msk [vmem:[%s809_s27 + $0x20] sm:$0xf] %vm483_vm1, %v657_v28  ;;  %487 = vst.msk [vmem:[%s809_s27 + $0xc] sm:$0xf] %vm483_vm1, %v652_v29  ;;  %v658_v33 = vpack.c.bf16 %v392_v30, %v392_v30 }
  0xee   : > { %495 = vst.msk [vmem:[%s809_s27 + $0x2c] sm:$0xf] %vm483_vm1, %v660_v31  ;;  %485 = vst.msk [vmem:[%s809_s27 + $0x4] sm:$0xf] %vm483_vm1, %v650_v32  ;;  %v682_v34 = vpop.f32.mrb[4].mxu0 }
  0xef   : > { %493 = vst.msk [vmem:[%s809_s27 + $0x24] sm:$0xf] %vm483_vm1, %v658_v33  ;;  %v381_v35 = vadd.f32 %v682_v34, %v613_v9  ;;  %v690_v36 = vpop.f32.mrb[4].mxu1  ;;  %v372_v37 = vpop.f32.mrb[5].mxu0 }
  0xf0   : > { %v413_v38 = vadd.f32 %v690_v36, %v613_v9  ;;  %v373_v39 = vadd.f32 %v613_v9, %v372_v37  ;;  %v404_v40 = vpop.f32.mrb[5].mxu1  ;;  %v683_v41 = vpop.f32.mrb[6].mxu0 }
  0xf1   : > { %v655_v42 = vpack.c.bf16 %v381_v35, %v381_v35  ;;  %v405_v43 = vadd.f32 %v613_v9, %v404_v40  ;;  %v384_v44 = vadd.f32 %v683_v41, %v613_v9  ;;  %v691_v45 = vpop.f32.mrb[6].mxu1  ;;  %v375_v46 = vpop.f32.mrb[7].mxu0 }
  0xf2   : > { %v663_v47 = vpack.c.bf16 %v413_v38, %v413_v38  ;;  %v653_v48 = vpack.c.bf16 %v373_v39, %v373_v39  ;;  %v416_v49 = vadd.f32 %v691_v45, %v613_v9  ;;  %v376_v50 = vadd.f32 %v613_v9, %v375_v46  ;;  %v407_v51 = vpop.f32.mrb[7].mxu1 }
  0xf3   : > { %490 = vst.msk [vmem:[%s809_s27 + $0x18] sm:$0xf] %vm483_vm1, %v655_v42  ;;  %v661_v52 = vpack.c.bf16 %v405_v43, %v405_v43  ;;  %v656_v53 = vpack.c.bf16 %v384_v44, %v384_v44  ;;  %v408_v54 = vadd.f32 %v613_v9, %v407_v51 }
  0xf4   : > { %498 = vst.msk [vmem:[%s809_s27 + $0x38] sm:$0xf] %vm483_vm1, %v663_v47  ;;  %488 = vst.msk [vmem:[%s809_s27 + $0x10] sm:$0xf] %vm483_vm1, %v653_v48  ;;  %v664_v55 = vpack.c.bf16 %v416_v49, %v416_v49  ;;  %v654_v56 = vpack.c.bf16 %v376_v50, %v376_v50 }
  0xf5   : > { %496 = vst.msk [vmem:[%s809_s27 + $0x30] sm:$0xf] %vm483_vm1, %v661_v52  ;;  %491 = vst.msk [vmem:[%s809_s27 + $0x1c] sm:$0xf] %vm483_vm1, %v656_v53  ;;  %v662_v57 = vpack.c.bf16 %v408_v54, %v408_v54 }
  0xf6   : > { %499 = vst.msk [vmem:[%s809_s27 + $0x3c] sm:$0xf] %vm483_vm1, %v664_v55  ;;  %489 = vst.msk [vmem:[%s809_s27 + $0x14] sm:$0xf] %vm483_vm1, %v654_v56 }
  0xf7   : > { %497 = vst.msk [vmem:[%s809_s27 + $0x34] sm:$0xf] %vm483_vm1, %v662_v57 }
  0xf8 PF: > { %s13_s14 = sadd.s32 1, %s749_s14   ;;  %s856_s12 = smov %s745_s13 }
  0xf9   : > { %p10_p5 = scmp.ge.s32.totalorder %s13_s14, 4   ;;  %s857_s13 = smov %s859_s15 }
  0xfb   :  { %12 = sbr.rel (!%p10_p5) target bundleno = 2 (0x2), region = 68 }

</bundles_post_ra>
